<compile_context>
chip_gen: v7x
topology: tpu7x:2x2x1
jax: 0.10.0
libtpu: 0.0.40
codegen_flags: <defaults>
</compile_context>

<pallas_src>
import jax
import jax.numpy as jnp
from jax import lax
from jax.experimental import pallas as pl
from jax.experimental.pallas import tpu as pltpu

NUM_GROUPS = 32
EPS = 1e-6
_VMEM_LIMIT = 32 * 1024 * 1024      # explicit scoped-VMEM budget (safe on v5e/v6e/v7x)
_TILE_TARGET = 4 << 20              # ~4 MiB per-grid-step working set


def _pick_tile(seg, full, per_col_bytes, target=_TILE_TARGET, min_tiles=1):
    """Largest divisor d of `seg` that is lane-aligned (d % 128 == 0, or d == `full`
    i.e. the axis is untiled), keeps at least `min_tiles` tiles when possible, and
    fits the per-step byte target.  Returns None if no valid divisor exists."""
    valid = [d for d in range(1, seg + 1)
             if seg % d == 0 and (d % 128 == 0 or d == full)]
    if not valid:
        return None
    pref = [d for d in valid if seg // d >= min_tiles]
    pool = pref if pref else valid
    fitting = [d for d in pool if d * per_col_bytes <= target]
    return max(fitting) if fitting else min(pool)


def _split_hw(HW, per_col_bytes, target=_TILE_TARGET):
    """Split H*W into S parallel segments (S=2 when a lane-aligned tiling of HW/2
    exists -> both v7x TensorCores work on the stats pass even at N == 1)."""
    for s in (2, 1):
        if HW % s:
            continue
        thw = _pick_tile(HW // s, HW, per_col_bytes, target)
        if thw is not None:
            return s, thw
    return 1, HW


def spatial_norm(f, zq, gamma, beta, wy, by, wb, bb):
    """f: (N, C, H, W), zq: (N, Cz, Hq, Wq) -> (N, C, H, W)."""
    N, C, H, W = f.shape
    _, Cz, Hq, Wq = zq.shape
    HW = H * W
    assert C % NUM_GROUPS == 0, "GroupNorm(32) requires C % 32 == 0"
    cpg = C // NUM_GROUPS

    # ---- glue (plain JAX): nearest upsample of zq + parameter packing ----
    idx_h = (jnp.arange(H) * Hq) // H
    idx_w = (jnp.arange(W) * Wq) // W
    zq_up = zq[:, :, idx_h, :][:, :, :, idx_w].reshape(N, Cz, HW)

    f2 = f.reshape(N, C, HW)
    gamma2 = gamma.reshape(C, 1).astype(jnp.float32)
    beta2 = beta.reshape(C, 1).astype(jnp.float32)
    # Concatenated 1x1-conv weights: one MXU weight push / one result stream.
    wcat = jnp.concatenate([wy, wb], axis=0).astype(zq.dtype)            # (2C, Cz)
    bcat = jnp.concatenate([by, bb], axis=0).reshape(2 * C, 1).astype(jnp.float32)

    fbytes = f.dtype.itemsize
    zbytes = zq.dtype.itemsize

    # -------- pass 1: per-channel partial sums (streaming, megacore-split) --------
    S, thw_s = _split_hw(HW, 2 * C * fbytes + 8 * C)
    T_s = (HW // S) // thw_s

    def stats_kernel(f_ref, psum_ref, psq_ref):
        @pl.when(pl.program_id(2) == 0)
        def _():
            psum_ref[...] = jnp.zeros_like(psum_ref)
            psq_ref[...] = jnp.zeros_like(psq_ref)

        x = f_ref[0].astype(jnp.float32)                       # (C, thw_s)
        psum_ref[0, 0] += jnp.sum(x, axis=-1, keepdims=True)   # lane reduction (XLU)
        psq_ref[0, 0] += jnp.sum(x * x, axis=-1, keepdims=True)

    psum, psq = pl.pallas_call(
        stats_kernel,
        out_shape=(jax.ShapeDtypeStruct((N, S, C, 1), jnp.float32),
                   jax.ShapeDtypeStruct((N, S, C, 1), jnp.float32)),
        grid_spec=pltpu.PrefetchScalarGridSpec(
            num_scalar_prefetch=0,
            grid=(N, S, T_s),
            in_specs=[
                pl.BlockSpec((1, C, thw_s), lambda n, s, t: (n, 0, s * T_s + t)),
            ],
            out_specs=(
                pl.BlockSpec((1, 1, C, 1), lambda n, s, t: (n, s, 0, 0)),
                pl.BlockSpec((1, 1, C, 1), lambda n, s, t: (n, s, 0, 0)),
            ),
        ),
        compiler_params=pltpu.CompilerParams(
            dimension_semantics=("parallel", "parallel", "arbitrary"),
            vmem_limit_bytes=_VMEM_LIMIT),
    )(f2)

    # -------- pass 2: fold partials + affine params into scale/shift (tiny) --------
    inv_cnt = 1.0 / float(cpg * HW)

    def fold_kernel(psum_ref, psq_ref, g_ref, b_ref, ss_ref):
        s_sum = jnp.sum(psum_ref[0], axis=0)                   # (C, 1)
        s_sq = jnp.sum(psq_ref[0], axis=0)                     # (C, 1)

        # Group-combine the per-channel sums with tiny constant matmuls
        # (avoids any (C,HW)->(G,cpg*HW) tile-boundary-crossing reshape).
        g_of_c = lax.broadcasted_iota(jnp.int32, (NUM_GROUPS, C), 1) // cpg
        g_row = lax.broadcasted_iota(jnp.int32, (NUM_GROUPS, C), 0)
        m_fwd = (g_of_c == g_row).astype(jnp.float32)           # (G, C)
        c_grp = lax.broadcasted_iota(jnp.int32, (C, NUM_GROUPS), 0) // cpg
        g_col = lax.broadcasted_iota(jnp.int32, (C, NUM_GROUPS), 1)
        m_back = (c_grp == g_col).astype(jnp.float32)           # (C, G)

        g_sum = jnp.dot(m_fwd, s_sum, preferred_element_type=jnp.float32)    # (G, 1)
        g_sq = jnp.dot(m_fwd, s_sq, preferred_element_type=jnp.float32)
        g_mean = g_sum * inv_cnt
        g_var = g_sq * inv_cnt - g_mean * g_mean
        g_inv = lax.rsqrt(g_var + EPS)

        mean_c = jnp.dot(m_back, g_mean, preferred_element_type=jnp.float32)  # (C, 1)
        inv_c = jnp.dot(m_back, g_inv, preferred_element_type=jnp.float32)

        scale = g_ref[...] * inv_c                              # (C, 1)
        shift = b_ref[...] - mean_c * scale
        lane = lax.broadcasted_iota(jnp.int32, (C, 2), 1)
        ss_ref[0] = jnp.where(lane == 0, scale, shift)          # (C, 2)

    scale_shift = pl.pallas_call(
        fold_kernel,
        out_shape=jax.ShapeDtypeStruct((N, C, 2), jnp.float32),
        grid_spec=pltpu.PrefetchScalarGridSpec(
            num_scalar_prefetch=0,
            grid=(N,),
            in_specs=[
                pl.BlockSpec((1, S, C, 1), lambda n: (n, 0, 0, 0)),     # partial sums
                pl.BlockSpec((1, S, C, 1), lambda n: (n, 0, 0, 0)),     # partial sq-sums
                pl.BlockSpec((C, 1), lambda n: (0, 0)),                 # gamma
                pl.BlockSpec((C, 1), lambda n: (0, 0)),                 # beta
            ],
            out_specs=pl.BlockSpec((1, C, 2), lambda n: (n, 0, 0)),
        ),
        compiler_params=pltpu.CompilerParams(
            dimension_semantics=("parallel",),
            vmem_limit_bytes=_VMEM_LIMIT),
    )(psum, psq, gamma2, beta2)

    # ------------- pass 3: fused 1x1 convs + normalization epilogue -------------
    thw_a = _pick_tile(HW, HW, 2 * (2 * C * fbytes + Cz * zbytes) + 12 * C,
                       min_tiles=2 if N == 1 else 1)

    def apply_kernel(f_ref, zq_ref, ss_ref, w_ref, b_ref, o_ref):
        zqt = zq_ref[0]                                          # (Cz, thw_a)
        yb = jnp.dot(w_ref[...], zqt, preferred_element_type=jnp.float32)
        yb = yb + b_ref[...]                                     # (2C, thw_a)
        y = yb[:C]
        b = yb[C:]
        ss = ss_ref[0]                                           # (C, 2)
        scale = ss[:, 0:1]
        shift = ss[:, 1:2]
        u = f_ref[0] * scale + shift                             # normalized f
        o_ref[0] = (y * u + b).astype(o_ref.dtype)

    out = pl.pallas_call(
        apply_kernel,
        out_shape=jax.ShapeDtypeStruct((N, C, HW), f.dtype),
        grid_spec=pltpu.PrefetchScalarGridSpec(
            num_scalar_prefetch=0,
            grid=(N, HW // thw_a),
            in_specs=[
                pl.BlockSpec((1, C, thw_a), lambda n, t: (n, 0, t)),    # f tile
                pl.BlockSpec((1, Cz, thw_a), lambda n, t: (n, 0, t)),   # zq tile
                pl.BlockSpec((1, C, 2), lambda n, t: (n, 0, 0)),        # scale/shift
                pl.BlockSpec((2 * C, Cz), lambda n, t: (0, 0)),         # fused weights
                pl.BlockSpec((2 * C, 1), lambda n, t: (0, 0)),          # fused biases
            ],
            out_specs=pl.BlockSpec((1, C, thw_a), lambda n, t: (n, 0, t)),
        ),
        compiler_params=pltpu.CompilerParams(
            dimension_semantics=("parallel", "parallel"),
            vmem_limit_bytes=_VMEM_LIMIT),
    )(f2, zq_up, scale_shift, wcat, bcat)

    return out.reshape(N, C, H, W)


def _reference(f, zq, gamma, beta, wy, by, wb, bb):
    """Plain-JAX reference for validation."""
    N, C, H, W = f.shape
    _, Cz, Hq, Wq = zq.shape
    idx_h = (jnp.arange(H) * Hq) // H
    idx_w = (jnp.arange(W) * Wq) // W
    zq_up = zq[:, :, idx_h, :][:, :, :, idx_w]
    cpg = C // NUM_GROUPS
    fg = f.reshape(N, NUM_GROUPS, cpg * H * W)
    mean = fg.mean(-1, keepdims=True)
    var = ((fg - mean) ** 2).mean(-1, keepdims=True)
    norm = ((fg - mean) / jnp.sqrt(var + EPS)).reshape(N, C, H, W)
    norm = norm * gamma[None, :, None, None] + beta[None, :, None, None]
    y = jnp.einsum('co,nohw->nchw', wy, zq_up) + by[None, :, None, None]
    b = jnp.einsum('co,nohw->nchw', wb, zq_up) + bb[None, :, None, None]
    return norm * y + b


if __name__ == "__main__":
    # Small shapes consistent with the module: f_channels divisible by 32 groups.
    N, C, H, W = 2, 32, 16, 16        # f: (N, f_channels, H, W)
    Cz, Hq, Wq = 8, 8, 8              # zq: (N, zq_channels, Hq, Wq)

    key = jax.random.PRNGKey(0)
    kf, kz, kg, kb, kwy, kby, kwb, kbb = jax.random.split(key, 8)

    f = jax.random.normal(kf, (N, C, H, W), dtype=jnp.float32)
    zq = jax.random.normal(kz, (N, Cz, Hq, Wq), dtype=jnp.float32)

    gamma = 1.0 + 0.05 * jax.random.normal(kg, (C,), dtype=jnp.float32)
    beta = 0.05 * jax.random.normal(kb, (C,), dtype=jnp.float32)
    wy = 0.1 * jax.random.normal(kwy, (C, Cz), dtype=jnp.float32)   # conv_y weight (C,Cz,1,1) squeezed
    by = 0.1 * jax.random.normal(kby, (C,), dtype=jnp.float32)
    wb = 0.1 * jax.random.normal(kwb, (C, Cz), dtype=jnp.float32)   # conv_b weight
    bb = 0.1 * jax.random.normal(kbb, (C,), dtype=jnp.float32)

    out = spatial_norm(f, zq, gamma, beta, wy, by, wb, bb)
    jax.block_until_ready(out)

    ref = _reference(f, zq, gamma, beta, wy, by, wb, bb)
    assert out.shape == (N, C, H, W)
    assert jnp.allclose(out, ref, atol=1e-4, rtol=1e-4), "mismatch vs reference"

    print("KERNEL_OK")
</pallas_src>

<mosaic_0001>
module attributes {stable_mosaic.version = 11 : i64} {
  func.func @stats_kernel(%arg0: i32, %arg1: i32, %arg2: i32, %arg3: memref<1x32x128xf32, #tpu.memory_space<vmem>>, %arg4: memref<1x1x32x1xf32, #tpu.memory_space<vmem>>, %arg5: memref<1x1x32x1xf32, #tpu.memory_space<vmem>>) attributes {dimension_semantics = [#tpu.dimension_semantics<parallel>, #tpu.dimension_semantics<parallel>, #tpu.dimension_semantics<arbitrary>], iteration_bounds = array<i64: 2, 2, 1>, scalar_prefetch = 0 : i64, scratch_operands = 0 : i64, tpu.core_type = #tpu.core_type<tc>, window_params = [{transform_indices = @transform_0, window_bounds = array<i64: 1, 32, 128>}, {transform_indices = @transform_1, window_bounds = array<i64: 1, 1, 32, 1>}, {transform_indices = @transform_2, window_bounds = array<i64: 1, 1, 32, 1>}]} {
    %c0_i32 = arith.constant 0 : i32
    %0 = arith.cmpi eq, %arg2, %c0_i32 : i32
    %1 = arith.extui %0 : i1 to i32
    %c0_i32_0 = arith.constant 0 : i32
    %2 = arith.cmpi ne, %1, %c0_i32_0 : i32
    scf.if %2 {
      %cst_20 = arith.constant 0.000000e+00 : f32
      %22 = vector.broadcast %cst_20 : f32 to vector<1x1x32x1xf32>
      %c0_21 = arith.constant 0 : index
      %c0_22 = arith.constant 0 : index
      %c0_23 = arith.constant 0 : index
      %c0_24 = arith.constant 0 : index
      %23 = vector.load %arg4[%c0_21, %c0_22, %c0_23, %c0_24] : memref<1x1x32x1xf32, #tpu.memory_space<vmem>>, vector<1x1x32x1xf32>
      tpu.vector_store %arg4[%c0_21, %c0_22, %c0_23, %c0_24], %22 {strides = array<i32>} : memref<1x1x32x1xf32, #tpu.memory_space<vmem>>, vector<1x1x32x1xf32>,
      %cst_25 = arith.constant 0.000000e+00 : f32
      %24 = vector.broadcast %cst_25 : f32 to vector<1x1x32x1xf32>
      %c0_26 = arith.constant 0 : index
      %c0_27 = arith.constant 0 : index
      %c0_28 = arith.constant 0 : index
      %c0_29 = arith.constant 0 : index
      %25 = vector.load %arg5[%c0_26, %c0_27, %c0_28, %c0_29] : memref<1x1x32x1xf32, #tpu.memory_space<vmem>>, vector<1x1x32x1xf32>
      tpu.vector_store %arg5[%c0_26, %c0_27, %c0_28, %c0_29], %24 {strides = array<i32>} : memref<1x1x32x1xf32, #tpu.memory_space<vmem>>, vector<1x1x32x1xf32>,
    } else {
    }
    %c0 = arith.constant 0 : index
    %c0_1 = arith.constant 0 : index
    %c0_2 = arith.constant 0 : index
    %3 = vector.load %arg3[%c0, %c0_1, %c0_2] : memref<1x32x128xf32, #tpu.memory_space<vmem>>, vector<1x32x128xf32>
    %4 = vector.shape_cast %3 : vector<1x32x128xf32> to vector<32x128xf32>
    %c0_3 = arith.constant 0 : index
    %c0_4 = arith.constant 0 : index
    %c0_5 = arith.constant 0 : index
    %c0_6 = arith.constant 0 : index
    %5 = vector.load %arg4[%c0_3, %c0_4, %c0_5, %c0_6] : memref<1x1x32x1xf32, #tpu.memory_space<vmem>>, vector<1x1x32x1xf32>
    %6 = vector.shape_cast %5 : vector<1x1x32x1xf32> to vector<32x1xf32>
    %cst = arith.constant dense<0.000000e+00> : vector<32xf32>
    %7 = vector.multi_reduction <add>, %4, %cst [1] : vector<32x128xf32> to vector<32xf32>
    %8 = vector.shape_cast %7 : vector<32xf32> to vector<32x1xf32>
    %9 = arith.addf %6, %8 : vector<32x1xf32>
    %c0_7 = arith.constant 0 : index
    %c0_8 = arith.constant 0 : index
    %c0_9 = arith.constant 0 : index
    %c0_10 = arith.constant 0 : index
    %10 = vector.load %arg4[%c0_7, %c0_8, %c0_9, %c0_10] : memref<1x1x32x1xf32, #tpu.memory_space<vmem>>, vector<1x1x32x1xf32>
    %11 = vector.shape_cast %10 : vector<1x1x32x1xf32> to vector<32x1xf32>
    %12 = vector.shape_cast %9 : vector<32x1xf32> to vector<1x1x32x1xf32>
    tpu.vector_store %arg4[%c0_7, %c0_8, %c0_9, %c0_10], %12 {strides = array<i32>} : memref<1x1x32x1xf32, #tpu.memory_space<vmem>>, vector<1x1x32x1xf32>,
    %c0_11 = arith.constant 0 : index
    %c0_12 = arith.constant 0 : index
    %c0_13 = arith.constant 0 : index
    %c0_14 = arith.constant 0 : index
    %13 = vector.load %arg5[%c0_11, %c0_12, %c0_13, %c0_14] : memref<1x1x32x1xf32, #tpu.memory_space<vmem>>, vector<1x1x32x1xf32>
    %14 = vector.shape_cast %13 : vector<1x1x32x1xf32> to vector<32x1xf32>
    %15 = arith.mulf %4, %4 : vector<32x128xf32>
    %cst_15 = arith.constant dense<0.000000e+00> : vector<32xf32>
    %16 = vector.multi_reduction <add>, %15, %cst_15 [1] : vector<32x128xf32> to vector<32xf32>
    %17 = vector.shape_cast %16 : vector<32xf32> to vector<32x1xf32>
    %18 = arith.addf %14, %17 : vector<32x1xf32>
    %c0_16 = arith.constant 0 : index
    %c0_17 = arith.constant 0 : index
    %c0_18 = arith.constant 0 : index
    %c0_19 = arith.constant 0 : index
    %19 = vector.load %arg5[%c0_16, %c0_17, %c0_18, %c0_19] : memref<1x1x32x1xf32, #tpu.memory_space<vmem>>, vector<1x1x32x1xf32>
    %20 = vector.shape_cast %19 : vector<1x1x32x1xf32> to vector<32x1xf32>
    %21 = vector.shape_cast %18 : vector<32x1xf32> to vector<1x1x32x1xf32>
    tpu.vector_store %arg5[%c0_16, %c0_17, %c0_18, %c0_19], %21 {strides = array<i32>} : memref<1x1x32x1xf32, #tpu.memory_space<vmem>>, vector<1x1x32x1xf32>,
    return
  }
  func.func @transform_0(%arg0: i32, %arg1: i32, %arg2: i32) -> (i32, i32, i32) {
    %c1_i32 = arith.constant 1 : i32
    %0 = arith.muli %arg1, %c1_i32 : i32
    %1 = arith.addi %0, %arg2 : i32
    %c0_i32 = arith.constant 0 : i32
    %c0_i32_0 = arith.constant 0 : i32
    return %arg0, %c0_i32, %1 : i32, i32, i32
  }
  func.func @transform_1(%arg0: i32, %arg1: i32, %arg2: i32) -> (i32, i32, i32, i32) {
    %c0_i32 = arith.constant 0 : i32
    %c0_i32_0 = arith.constant 0 : i32
    %c0_i32_1 = arith.constant 0 : i32
    return %arg0, %arg1, %c0_i32, %c0_i32_0 : i32, i32, i32, i32
  }
  func.func @transform_2(%arg0: i32, %arg1: i32, %arg2: i32) -> (i32, i32, i32, i32) {
    %c0_i32 = arith.constant 0 : i32
    %c0_i32_0 = arith.constant 0 : i32
    %c0_i32_1 = arith.constant 0 : i32
    return %arg0, %arg1, %c0_i32, %c0_i32_0 : i32, i32, i32, i32
  }
}

</mosaic_0001>

<bundles_post_ra>
// kernel: tpu_custom_call.1
= control target key start
LH: loop header
LB: loop body
LE: loop exit
PB: predicated region body
PF: predicated region fallthrough
CT: control target
= control target key end

     0   :  { %8 = vsyncpa [#allocation3], 0  ;;  %s852_s0 = inlined_call_operand.hbm [shape: f32[2,32,256], index: 0, kind: input, shape index: {}]   ;;  %s853_s1 = inlined_call_operand.vmem [shape: f32[2,2,32,1], index: 1, kind: output, shape index: {0}]   ;;  %s854_s2 = inlined_call_operand.vmem [shape: f32[2,2,32,1], index: 2, kind: output, shape index: {1}]  }
   0x1   :  { %10 = vsyncpa [#allocation3 + $0x1], 0  ;;  %s652_s9 = smov 0   ;;  %s654_s10 = smov 0  }
   0x2   :  { %s656_s11 = smov 0   ;;  %s658_s12 = smov 0  }
   0x3   :  { %s660_s13 = smov 0   ;;  %s662_s14 = smov 0  }
   0x4   :  { %s664_s15 = smov 0   ;;  %s666_s16 = smov 0  }
   0x5 LB: > { %s442_s17 = sadd.s32 4294967295, %s630_s16   ;;  %s31_s18 = sadd.s32 1, %s622_s14  ;;  %s630_s16 = sphi %s666_s16, %s16_s16   ;;  %s626_s15 = sphi %s664_s15, %s865_s15   ;;  %s622_s14 = sphi %s662_s14, %s864_s14   ;;  %s618_s13 = sphi %s660_s13, %s863_s13   ;;  %s614_s12 = sphi %s658_s12, %s862_s12   ;;  %s610_s11 = sphi %s656_s11, %s861_s11   ;;  %s606_s10 = sphi %s654_s10, %s860_s10   ;;  %s602_s9 = sphi %s652_s9, %s859_s9  }
   0x6   : > { %p33_p0 = scmp.ge.s32.totalorder %s31_s18, 2  ;;  %s35_s19 = sadd.s32 1, %s626_s15 }
   0x7   : > { %s46_s20 = sadd.s32 1, %s610_s11  ;;  %p53_p1 = scmp.ne.s32.totalorder %s610_s11, %s606_s10 }
   0x8   : > { %s867_s18 = smov (%p33_p0, %s31_s18), 0  ;;  %s869_s19 = smov (!%p33_p0, %s35_s19), %s626_s15 }
   0x9   : > { %s42_s21 = ssub.s32 %s622_s14, %s867_s18  ;;  %p54_p2 = scmp.eq.s32.totalorder %s630_s16, 0 }
   0xa   : > { %p37_p3 = scmp.ge.s32.totalorder %s869_s19, 2  ;;  %p59_p4 = scmp.ne.s32.totalorder %s606_s10, %s602_s9 }
   0xb   : > { %p703_p5 = por %p54_p2, %p53_p1  ;;  %p60_p6 = scmp.eq.s32.totalorder %s442_s17, 0 }
   0xc   : > { %s871_s19 = smov (%p37_p3, %s869_s19), 0  ;;  %p465_p8 = scmp.lt.s32.totalorder %s630_s16, 4 }
   0xd   : > { %p709_p7 = por %p60_p6, %p59_p4  ;;  %s41_s24 = ssub.s32 %s626_s15, %s871_s19 }
   0xe   : > { %s43_s25 = sor.u32 %s42_s21, %s41_s24  ;;  %s139_s26 = sand.u32 1, %s610_s11  }
   0xf   : > { %p44_p9 = scmp.eq.s32.totalorder %s43_s25, 0  ;;  %s446_s27 = sshll.u32 %s139_s26, 5 }
  0x10   : > { %s447_s28 = sshll.u32 %s626_s15, 3  ;;  %s143_s4 = scalar_lea.vmem [#allocation2], %s446_s27 }
  0x11   : > { %s719_s29 = scalar_select %p44_p9, %s610_s11, %s46_s20  }
  0x12   : > { %s149_s30 = sadd.s32 %s622_s14, %s447_s28  ;;  %s152_s5 = sshll.u32 %s143_s4, 4  ;;  %s727_s5 = int_to_ptr.vmem [resolvable:$true] %s152_s5 }
  0x13   : > { %s448_s3 = sshll.u32 %s149_s30, 7  ;;  %p733_p10 = pnand %p465_p8, %p703_p5 }
  0x14   : > { %s725_s8 = scalar_lea.hbm %s852_s0, %s448_s3  ;;  %s738_s17 = scalar_lea.sflag [#allocation3], %s139_s26 }
  0x15   : > { %s534_s20 = scalar_lea.hbm %s725_s8, 512  ;;  %p536_p13 = pneg %p733_p10 }
  0x16   : > { %p535_p12 = scmp.ne.s32.totalorder %s725_s8, %s534_s20  ;;  %s539_s24 = scalar_lea.hbm %s852_s0, 2048 }
  0x17   : > { %p540_p2 = scmp.lt.u32.totalorder %s725_s8, %s852_s0  ;;  %p541_p3 = scmp.lt.u32.totalorder %s539_s24, %s534_s20 }
  0x18   : > { %p537_p0 = pnand %p536_p13, %p535_p12  ;;  %p543_p5 = scmp.lt.u32.totalorder %s534_s20, %s725_s8 }
  0x19   : > { %p542_p4 = por %p541_p3, %p540_p2 }
  0x1a   : > { %p538_p1 = pneg %p537_p0 }
  0x1b   : > { %p544_p6 = por %p543_p5, %p542_p4 }
  0x1d   : > { %p545_p8 = pnand %p544_p6, %p538_p1 }
  0x1f   : > { %548 = shalt.err (!%p545_p8)
}
  0x20   : > { %s549_s26 = scalar_lea.vmem %s727_s5, 512  ;;  %s632_s28 = smov [#allocation2]  }
  0x21   : > { %p550_p9 = scmp.ne.s32.totalorder %s727_s5, %s549_s26  ;;  %s554_s30 = sshll.u32 %s632_s28, 4  ;;  %s555_s30 = int_to_ptr.vmem [resolvable:$false] %s554_s30 }
  0x22   : > { %s556_s3 = scalar_lea.vmem %s555_s30, 1024  ;;  %p557_p11 = scmp.lt.s32.totalorder %s727_s5, %s555_s30 }
  0x23   : > { %p552_p12 = pnand %p550_p9, %p536_p13  ;;  %p558_p2 = scmp.lt.s32.totalorder %s556_s3, %s549_s26 }
  0x25   : > { %p553_p0 = pneg %p552_p12  ;;  %p559_p3 = por %p558_p2, %p557_p11 }
  0x27   : > { %p560_p4 = pnand %p559_p3, %p553_p0 }
  0x29   : > { %563 = shalt.err (!%p560_p4)
}
  0x2a   : > { %s633_s4 = smov 256   ;;  %s634_s6 = smov 128  }
  0x2b   : > { %s635_s7 = smov 8   ;;  %p160_p13 = scmp.lt.s32.totalorder %s630_s16, 5 }
  0x2c   : > { %464 = dma.hbm_to_vmem [thread:$0]  (!%p733_p10), %s725_s8, 512, %s727_s5, %s738_s17, %s633_s4, %s634_s6, %s635_s7  }
  0x2d   : > { %p858_p1 = scmp.ge.s32.totalorder %s630_s16, 1 }
  0x2f   : > { %p161_p5 = pnand %p858_p1, %p160_p13 }
  0x30   : > { %s166_s20 = sand.u32 (!%p161_p5), 1, %s606_s10  }
  0x31   : > { %164 = sbr.rel (%p161_p5) target bundleno = 215 (0xd7), region = 24  ;;  %s450_s21 = sshll.u32 (!%p161_p5), %s166_s20, 5 }
  0x32   : > { %s167_s22 = scalar_lea.sflag (!%p161_p5), [#allocation3], %s166_s20  ;;  %s170_s24 = scalar_lea.vmem (!%p161_p5), [#allocation2], %s450_s21 }
  0x38   : > { %597 = dma.done.wait (%p709_p7), %s167_s22, 512  }
  0x39   : > { %599 = vsyncadd (%p709_p7), %s167_s22, 4294966784  ;;  %p205_p10 = scmp.lt.s32.totalorder %s618_s13, 1  ;;  %p207_p11 = scmp.lt.s32.totalorder %s614_s12, 1  ;;  %vm227_vm0 = vcmask 7168   ;;  %v238_v0 = vld [vmem:[%s170_s24 + $0x10] sm:$0xff]  ;;  %v236_v1 = vld [vmem:[%s170_s24] sm:$0xff] }
  0x3a   : > { %248 = vadd.xlane.f32.xlu1 %v238_v0  ;;  %244 = vadd.xlane.f32.xlu0 %v236_v1  ;;  %v239_v2 = vld [vmem:[%s170_s24 + $0x18] sm:$0xff]  ;;  %v237_v3 = vld [vmem:[%s170_s24 + $0x8] sm:$0xff]  ;;  %v636_v4 = vmov 0.0   ;;  %v265_v6 = vmul.f32 %v236_v1, %v236_v1  ;;  %v267_v8 = vmul.f32 %v238_v0, %v238_v0 }
  0x3b   : > { %s873_s13 = smov (!%p205_p10, %s618_s13), 1  ;;  %s875_s12 = smov (!%p207_p11, %s614_s12), 1  ;;  %v266_v5 = vmul.f32 %v237_v3, %v237_v3  ;;  %v268_v7 = vmul.f32 %v239_v2, %v239_v2 }
  0x3c   : > { %s452_s5 = sshll.u32 %s873_s13, 3  ;;  %s451_s8 = sshll.u32 %s875_s12, 2 }
  0x3d   : > { %s211_s9 = sadd.s32 %s452_s5, %s451_s8 }
  0x3e   : > { %s453_s17 = sshll.u32 %s211_s9, 3  ;;  %250 = vadd.xlane.f32.xlu1 %v239_v2  ;;  %246 = vadd.xlane.f32.xlu0 %v237_v3 }
  0x3f   : > { %s781_s27 = scalar_lea.vmem %s853_s1, %s453_s17  ;;  %s794_s26 = scalar_lea.vmem %s854_s2, %s453_s17 }
  0x40   : > { %230 = vst.msk [vmem:[%s781_s27 + $0x10] sm:$0xff] %vm227_vm0, %v636_v4  ;;  %228 = vst.msk [vmem:[%s781_s27] sm:$0xff] %vm227_vm0, %v636_v4 }
  0x41   : > { %229 = vst.msk [vmem:[%s781_s27 + $0x8] sm:$0xff] %vm227_vm0, %v636_v4  ;;  %231 = vst.msk [vmem:[%s781_s27 + $0x18] sm:$0xff] %vm227_vm0, %v636_v4 }
  0x42   : > { %271 = vadd.xlane.f32.xlu1 %v266_v5  ;;  %269 = vadd.xlane.f32.xlu0 %v265_v6  ;;  %233 = vst.msk [vmem:[%s794_s26 + $0x8] sm:$0xff] %vm227_vm0, %v636_v4  ;;  %232 = vst.msk [vmem:[%s794_s26] sm:$0xff] %vm227_vm0, %v636_v4 }
  0x43   : > { %234 = vst.msk [vmem:[%s794_s26 + $0x10] sm:$0xff] %vm227_vm0, %v636_v4  ;;  %235 = vst.msk [vmem:[%s794_s26 + $0x18] sm:$0xff] %vm227_vm0, %v636_v4 }
  0x46   : > { %275 = vadd.xlane.f32.xlu1 %v268_v7  ;;  %273 = vadd.xlane.f32.xlu0 %v267_v8 }
  0x47   : > { %v242_v9 = vld [vmem:[%s781_s27 + $0x10] sm:$0xff]  ;;  %v240_v10 = vld [vmem:[%s781_s27] sm:$0xff] }
  0x48   : > { %v243_v15 = vld [vmem:[%s781_s27 + $0x18] sm:$0xff]  ;;  %v241_v16 = vld [vmem:[%s781_s27 + $0x8] sm:$0xff] }
  0x49   : > { %v262_v21 = vld [vmem:[%s794_s26 + $0x8] sm:$0xff]  ;;  %v261_v22 = vld [vmem:[%s794_s26] sm:$0xff] }
  0x4a   : > { %v264_v27 = vld [vmem:[%s794_s26 + $0x18] sm:$0xff]  ;;  %v263_v28 = vld [vmem:[%s794_s26 + $0x10] sm:$0xff] }
  0xc7   : > { %v249_v11 = vpop.xlane.xlu1 %248  ;;  %v245_v12 = vpop.xlane.xlu0 %244 }
  0xc8   : > { %v254_v13 = vadd.f32 %v249_v11, %v242_v9  ;;  %v252_v14 = vadd.f32 %v245_v12, %v240_v10 }
  0xca   : > { %259 = vst.msk [vmem:[%s781_s27 + $0x10] sm:$0xff] %vm227_vm0, %v254_v13  ;;  %257 = vst.msk [vmem:[%s781_s27] sm:$0xff] %vm227_vm0, %v252_v14 }
  0xcb   : > { %v251_v17 = vpop.xlane.xlu1 %250  ;;  %v247_v18 = vpop.xlane.xlu0 %246 }
  0xcc   : > { %v255_v19 = vadd.f32 %v251_v17, %v243_v15  ;;  %v253_v20 = vadd.f32 %v247_v18, %v241_v16 }
  0xce   : > { %260 = vst.msk [vmem:[%s781_s27 + $0x18] sm:$0xff] %vm227_vm0, %v255_v19  ;;  %258 = vst.msk [vmem:[%s781_s27 + $0x8] sm:$0xff] %vm227_vm0, %v253_v20 }
  0xcf   : > { %v272_v23 = vpop.xlane.xlu1 %271  ;;  %v270_v24 = vpop.xlane.xlu0 %269 }
  0xd0   : > { %v278_v25 = vadd.f32 %v272_v23, %v262_v21  ;;  %v277_v26 = vadd.f32 %v270_v24, %v261_v22 }
  0xd2   : > { %282 = vst.msk [vmem:[%s794_s26 + $0x8] sm:$0xff] %vm227_vm0, %v278_v25  ;;  %281 = vst.msk [vmem:[%s794_s26] sm:$0xff] %vm227_vm0, %v277_v26 }
  0xd3   : > { %v276_v29 = vpop.xlane.xlu1 %275  ;;  %v274_v30 = vpop.xlane.xlu0 %273 }
  0xd4   : > { %v280_v31 = vadd.f32 %v276_v29, %v264_v27  ;;  %v279_v32 = vadd.f32 %v274_v30, %v263_v28 }
  0xd6   : > { %284 = vst.msk [vmem:[%s794_s26 + $0x18] sm:$0xff] %vm227_vm0, %v280_v31  ;;  %283 = vst.msk [vmem:[%s794_s26 + $0x10] sm:$0xff] %vm227_vm0, %v279_v32 }
  0xd7 PF: > { %s16_s16 = sadd.s32 1, %s630_s16   ;;  %s859_s9 = smov %s606_s10 }
  0xd8   : > { %p13_p7 = scmp.ge.s32.totalorder %s16_s16, 6   ;;  %s860_s10 = smov %s610_s11 }
  0xd9   : > { %s861_s11 = smov %s719_s29  ;;  %s862_s12 = smov %s622_s14 }
  0xda   : > { %s863_s13 = smov %s626_s15  ;;  %s864_s14 = smov %s867_s18 }
  0xdb   : > { %s865_s15 = smov %s871_s19  ;;  %15 = sbr.rel (!%p13_p7) target bundleno = 5 (0x5), region = 80 }
  0xe2   :  { %338 = vsyncpa [#allocation3], 1 }
  0xe3   :  { %340 = vsyncpa [#allocation3 + $0x1], 1 }

</bundles_post_ra>
